<compile_context>
chip_gen: v6e
topology: v6e:2x2x1
jax: 0.10.0
libtpu: 0.0.40
codegen_flags: <defaults>
</compile_context>

<pallas_src>
import jax
import jax.numpy as jnp
from jax.experimental import pallas as pl
from jax.experimental.pallas import tpu as pltpu

LANE = 128       # TPU vreg lane width
TILE_MULT = 16   # batch-tile multiple (bf16 sublane packing = 16 rows)


def _round_up(n, m):
    return ((n + m - 1) // m) * m


def _choose_batch_tile(B, block_b, mult=TILE_MULT):
    # Aim for >= 2 grid steps (both v7x TensorCores busy), tile a multiple of
    # `mult`, capped at block_b and at the (padded) batch itself.
    tb = min(block_b, _round_up(pl.cdiv(B, 2), mult))
    tb = max(tb, mult)
    return min(tb, _round_up(B, mult))


def dqn_kernel(x_ref, w1_ref, w2_ref, w3_ref, b_ref, o_ref):
    cd = w1_ref.dtype                                   # matmul-operand dtype
    bias = b_ref[...]                                   # (3, 128) f32, VMEM-resident
    # Layer 1: (tb, in_dim) @ (in_dim, 128) -> f32 accumulate on the MXU.
    h = jnp.dot(x_ref[...], w1_ref[...], preferred_element_type=jnp.float32)
    h = jnp.maximum(h + bias[0:1, :h.shape[1]], 0.0)    # bias + ReLU in f32 (VPU, v5e-safe)
    # Layer 2: (tb, 128) @ (128, 128)
    h = jnp.dot(h.astype(cd), w2_ref[...], preferred_element_type=jnp.float32)
    h = jnp.maximum(h + bias[1:2, :h.shape[1]], 0.0)
    # Layer 3: (tb, 128) @ (128, out_dim) -> narrow (masked) lane store.
    out = jnp.dot(h.astype(cd), w3_ref[...], preferred_element_type=jnp.float32)
    o_ref[...] = (out + bias[2:3, :out.shape[1]]).astype(o_ref.dtype)


def prepare_params(params, compute_dtype=jnp.bfloat16):
    """Pad hidden lane dims to 128, cast weights to the MXU dtype, fold biases.

    Call once (at init / after each optimizer step), not per forward pass.
    """
    (w1, b1), (w2, b2), (w3, b3) = params
    in_dim, h1 = w1.shape
    h2 = w2.shape[1]
    out_dim = w3.shape[1]
    h1_p, h2_p = _round_up(h1, LANE), _round_up(h2, LANE)

    w1p = jnp.zeros((in_dim, h1_p), compute_dtype).at[:, :h1].set(w1.astype(compute_dtype))
    w2p = jnp.zeros((h1_p, h2_p), compute_dtype).at[:h1, :h2].set(w2.astype(compute_dtype))
    w3p = jnp.zeros((h2_p, out_dim), compute_dtype).at[:h2, :].set(w3.astype(compute_dtype))

    bias_w = max(h1_p, h2_p)
    bias = jnp.zeros((3, bias_w), jnp.float32)
    bias = bias.at[0, :h1].set(b1.reshape(-1).astype(jnp.float32))
    bias = bias.at[1, :h2].set(b2.reshape(-1).astype(jnp.float32))
    bias = bias.at[2, :out_dim].set(b3.reshape(-1).astype(jnp.float32))

    return dict(w1=w1p, w2=w2p, w3=w3p, bias=bias,
                in_dim=in_dim, out_dim=out_dim, compute_dtype=compute_dtype)


def dqn_forward(x, prepared, *, block_b=512):
    """relu(x@W1+b1) -> relu(.@W2+b2) -> .@W3+b3  (PyTorch forward semantics)."""
    B, in_dim = x.shape
    assert in_dim == prepared["in_dim"]
    cd = prepared["compute_dtype"]
    out_dim = prepared["out_dim"]
    w1, w2, w3, bias = prepared["w1"], prepared["w2"], prepared["w3"], prepared["bias"]

    tb = _choose_batch_tile(B, block_b)
    b_p = _round_up(B, tb)

    # x is the only streamed operand: pre-cast to the compute dtype, pad batch
    # rows only if needed (no feature-dim padding in HBM).
    xc = x.astype(cd)
    if b_p != B:
        xc = jnp.zeros((b_p, in_dim), cd).at[:B].set(xc)

    def resident(arr):  # weights / biases stay VMEM-resident across grid steps
        return pl.BlockSpec(arr.shape, lambda i: (0, 0))

    out = pl.pallas_call(
        dqn_kernel,
        out_shape=jax.ShapeDtypeStruct((b_p, out_dim), jnp.float32),
        grid=(b_p // tb,),
        in_specs=[
            pl.BlockSpec((tb, in_dim), lambda i: (i, 0)),   # x: tiled on batch
            resident(w1), resident(w2), resident(w3), resident(bias),
        ],
        out_specs=pl.BlockSpec((tb, out_dim), lambda i: (i, 0)),
        compiler_params=pltpu.CompilerParams(
            dimension_semantics=("parallel",)),             # batch axis splits across TCs
    )(xc, w1, w2, w3, bias)

    return out[:B] if b_p != B else out


def init_linear(key, in_dim, out_dim):
    # PyTorch nn.Linear default init: U(-1/sqrt(in), 1/sqrt(in)); stored [in, out].
    kw, kb = jax.random.split(key)
    bound = 1.0 / jnp.sqrt(jnp.float32(in_dim))
    w = jax.random.uniform(kw, (in_dim, out_dim), jnp.float32, -bound, bound)
    b = jax.random.uniform(kb, (1, out_dim), jnp.float32, -bound, bound)
    return w, b


def ref_forward(x, params):
    (w1, b1), (w2, b2), (w3, b3) = params
    h = jnp.maximum(x @ w1 + b1, 0.0)
    h = jnp.maximum(h @ w2 + b2, 0.0)
    return h @ w3 + b3


# TODO(synk): nn.MSELoss / optim.Adam are training-side and not part of forward; not ported.

if __name__ == "__main__":
    input_dims, output_dims = 16, 4   # FrozenLake: 16-dim one-hot state, 4 actions

    key = jax.random.PRNGKey(0)
    k_x, k_x2, k1, k2, k3 = jax.random.split(key, 5)

    params = (
        init_linear(k1, input_dims, 64),
        init_linear(k2, 64, 64),
        init_linear(k3, 64, output_dims),
    )

    # Small toy batch (single env rollout chunk) and a replay-buffer-sized
    # batch that exercises the multi-step parallel batch grid.
    x_small = jax.random.normal(k_x, (8, input_dims), jnp.float32)
    x_big = jax.random.normal(k_x2, (256, input_dims), jnp.float32)

    ref_small = ref_forward(x_small, params)
    ref_big = ref_forward(x_big, params)

    # Pure-f32 compute path: must match PyTorch-semantics reference tightly.
    prep_f32 = prepare_params(params, compute_dtype=jnp.float32)
    out_small_f32 = jax.block_until_ready(dqn_forward(x_small, prep_f32))
    assert out_small_f32.shape == (8, output_dims)
    assert jnp.allclose(out_small_f32, ref_small, atol=1e-5, rtol=1e-5)

    out_big_f32 = jax.block_until_ready(dqn_forward(x_big, prep_f32))
    assert out_big_f32.shape == (256, output_dims)
    assert jnp.allclose(out_big_f32, ref_big, atol=1e-5, rtol=1e-5)

    # bf16 matmul-operand path (default on all TPU generations): looser tolerance.
    prep_bf16 = prepare_params(params, compute_dtype=jnp.bfloat16)
    out_big_bf16 = jax.block_until_ready(dqn_forward(x_big, prep_bf16))
    assert out_big_bf16.shape == (256, output_dims)
    assert jnp.allclose(out_big_bf16, ref_big, atol=5e-2, rtol=5e-2)

    print("KERNEL_OK")
</pallas_src>

<mosaic_0001>
module attributes {stable_mosaic.version = 11 : i64} {
  func.func @dqn_kernel(%arg0: i32, %arg1: memref<16x16xf32, #tpu.memory_space<vmem>>, %arg2: memref<16x128xf32, #tpu.memory_space<vmem>>, %arg3: memref<128x128xf32, #tpu.memory_space<vmem>>, %arg4: memref<128x4xf32, #tpu.memory_space<vmem>>, %arg5: memref<3x128xf32, #tpu.memory_space<vmem>>, %arg6: memref<16x4xf32, #tpu.memory_space<vmem>>) attributes {dimension_semantics = [#tpu.dimension_semantics<parallel>], iteration_bounds = array<i64: 1>, scalar_prefetch = 0 : i64, scratch_operands = 0 : i64, tpu.core_type = #tpu.core_type<tc>, window_params = [{transform_indices = @transform_0, window_bounds = array<i64: 16, 16>}, {pipeline_mode = #tpu.pipeline_mode<synchronous>, transform_indices = @transform_1, window_bounds = array<i64: 16, 128>}, {pipeline_mode = #tpu.pipeline_mode<synchronous>, transform_indices = @transform_2, window_bounds = array<i64: 128, 128>}, {pipeline_mode = #tpu.pipeline_mode<synchronous>, transform_indices = @transform_3, window_bounds = array<i64: 128, 4>}, {pipeline_mode = #tpu.pipeline_mode<synchronous>, transform_indices = @transform_4, window_bounds = array<i64: 3, 128>}, {transform_indices = @transform_5, window_bounds = array<i64: 16, 4>}]} {
    %c0 = arith.constant 0 : index
    %c0_0 = arith.constant 0 : index
    %0 = vector.load %arg5[%c0, %c0_0] : memref<3x128xf32, #tpu.memory_space<vmem>>, vector<3x128xf32>
    %c0_1 = arith.constant 0 : index
    %c0_2 = arith.constant 0 : index
    %1 = vector.load %arg1[%c0_1, %c0_2] : memref<16x16xf32, #tpu.memory_space<vmem>>, vector<16x16xf32>
    %c0_3 = arith.constant 0 : index
    %c0_4 = arith.constant 0 : index
    %2 = vector.load %arg2[%c0_3, %c0_4] : memref<16x128xf32, #tpu.memory_space<vmem>>, vector<16x128xf32>
    %cst = arith.constant dense<0.000000e+00> : vector<16x128xf32>
    %3 = tpu.matmul %1, %2, %cst {dimension_numbers = #tpu.dot_dimension_numbers<[1], [0], [0], [1], [0, 0, 1, 1], [], []>} : vector<16x16xf32>, vector<16x128xf32>, vector<16x128xf32> -> vector<16x128xf32>
    %4 = vector.extract_strided_slice %0 {offsets = [0, 0], sizes = [1, 128], strides = [1, 1]} : vector<3x128xf32> to vector<1x128xf32>
    %5 = vector.broadcast %4 : vector<1x128xf32> to vector<16x128xf32>
    %6 = arith.addf %3, %5 : vector<16x128xf32>
    %cst_5 = arith.constant 0.000000e+00 : f32
    %7 = vector.broadcast %cst_5 : f32 to vector<16x128xf32>
    %8 = arith.maximumf %6, %7 : vector<16x128xf32>
    %c0_6 = arith.constant 0 : index
    %c0_7 = arith.constant 0 : index
    %9 = vector.load %arg3[%c0_6, %c0_7] : memref<128x128xf32, #tpu.memory_space<vmem>>, vector<128x128xf32>
    %cst_8 = arith.constant dense<0.000000e+00> : vector<16x128xf32>
    %10 = tpu.matmul %8, %9, %cst_8 {dimension_numbers = #tpu.dot_dimension_numbers<[1], [0], [0], [1], [0, 0, 1, 1], [], []>} : vector<16x128xf32>, vector<128x128xf32>, vector<16x128xf32> -> vector<16x128xf32>
    %11 = vector.extract_strided_slice %0 {offsets = [1, 0], sizes = [1, 128], strides = [1, 1]} : vector<3x128xf32> to vector<1x128xf32>
    %12 = vector.broadcast %11 : vector<1x128xf32> to vector<16x128xf32>
    %13 = arith.addf %10, %12 : vector<16x128xf32>
    %cst_9 = arith.constant 0.000000e+00 : f32
    %14 = vector.broadcast %cst_9 : f32 to vector<16x128xf32>
    %15 = arith.maximumf %13, %14 : vector<16x128xf32>
    %c0_10 = arith.constant 0 : index
    %c0_11 = arith.constant 0 : index
    %16 = vector.load %arg4[%c0_10, %c0_11] : memref<128x4xf32, #tpu.memory_space<vmem>>, vector<128x4xf32>
    %cst_12 = arith.constant dense<0.000000e+00> : vector<16x4xf32>
    %17 = tpu.matmul %15, %16, %cst_12 {dimension_numbers = #tpu.dot_dimension_numbers<[1], [0], [0], [1], [0, 0, 1, 1], [], []>} : vector<16x128xf32>, vector<128x4xf32>, vector<16x4xf32> -> vector<16x4xf32>
    %18 = vector.extract_strided_slice %0 {offsets = [2, 0], sizes = [1, 4], strides = [1, 1]} : vector<3x128xf32> to vector<1x4xf32>
    %19 = vector.broadcast %18 : vector<1x4xf32> to vector<16x4xf32>
    %20 = arith.addf %17, %19 : vector<16x4xf32>
    %c0_13 = arith.constant 0 : index
    %c0_14 = arith.constant 0 : index
    %21 = vector.load %arg6[%c0_13, %c0_14] : memref<16x4xf32, #tpu.memory_space<vmem>>, vector<16x4xf32>
    tpu.vector_store %arg6[%c0_13, %c0_14], %20 {strides = array<i32>} : memref<16x4xf32, #tpu.memory_space<vmem>>, vector<16x4xf32>,
    return
  }
  func.func @transform_0(%arg0: i32) -> (i32, i32) {
    %c0_i32 = arith.constant 0 : i32
    %c0_i32_0 = arith.constant 0 : i32
    return %arg0, %c0_i32 : i32, i32
  }
  func.func @transform_1(%arg0: i32) -> (i32, i32) {
    %c0_i32 = arith.constant 0 : i32
    %c0_i32_0 = arith.constant 0 : i32
    %c0_i32_1 = arith.constant 0 : i32
    return %c0_i32, %c0_i32_0 : i32, i32
  }
  func.func @transform_2(%arg0: i32) -> (i32, i32) {
    %c0_i32 = arith.constant 0 : i32
    %c0_i32_0 = arith.constant 0 : i32
    %c0_i32_1 = arith.constant 0 : i32
    return %c0_i32, %c0_i32_0 : i32, i32
  }
  func.func @transform_3(%arg0: i32) -> (i32, i32) {
    %c0_i32 = arith.constant 0 : i32
    %c0_i32_0 = arith.constant 0 : i32
    %c0_i32_1 = arith.constant 0 : i32
    return %c0_i32, %c0_i32_0 : i32, i32
  }
  func.func @transform_4(%arg0: i32) -> (i32, i32) {
    %c0_i32 = arith.constant 0 : i32
    %c0_i32_0 = arith.constant 0 : i32
    %c0_i32_1 = arith.constant 0 : i32
    return %c0_i32, %c0_i32_0 : i32, i32
  }
  func.func @transform_5(%arg0: i32) -> (i32, i32) {
    %c0_i32 = arith.constant 0 : i32
    %c0_i32_0 = arith.constant 0 : i32
    return %arg0, %c0_i32 : i32, i32
  }
}

</mosaic_0001>

<bundles_post_ra>
// kernel: tpu_custom_call.1
= control target key start
LH: loop header
LB: loop body
LE: loop exit
PB: predicated region body
PF: predicated region fallthrough
CT: control target
= control target key end

     0   :  { %10 = vsyncpa [#allocation3], 0  ;;  %s656_s0 = inlined_call_operand.hbm [shape: f32[16,16], index: 0, kind: input, shape index: {}]   ;;  %s657_s1 = inlined_call_operand.hbm [shape: f32[16,128], index: 1, kind: input, shape index: {}]   ;;  %s658_s2 = inlined_call_operand.vmem [shape: f32[128,128], index: 2, kind: input, shape index: {}]   ;;  %s659_s3 = inlined_call_operand.vmem [shape: f32[128,4], index: 3, kind: input, shape index: {}]   ;;  %s660_s4 = inlined_call_operand.vmem [shape: f32[3,128], index: 4, kind: input, shape index: {}]   ;;  %s661_s5 = inlined_call_operand.vmem [shape: f32[16,4], index: 5, kind: output, shape index: {}]  }
   0x1   :  { %11 = vsyncpa [#allocation5], 0  ;;  %s509_s18 = smov [#allocation2]  }
   0x2   :  { %s17_s19 = sshll.u32 %s509_s18, 4  ;;  %s18_s19 = int_to_ptr.vmem [resolvable:$true] %s17_s19 }
   0x3   :  { %s473_s20 = scalar_lea.vmem %s18_s19, 256  ;;  %p478_p1 = scmp.lt.s32.totalorder %s18_s19, %s18_s19 }
   0x4   :  { %p474_p0 = scmp.ne.s32.totalorder %s18_s19, %s473_s20  ;;  %p479_p2 = scmp.lt.s32.totalorder %s473_s20, %s473_s20 }
   0x6   :  { %p480_p3 = por %p479_p2, %p478_p1 }
   0x8   :  { %p481_p4 = pnand %p480_p3, %p474_p0 }
   0xa   :  { %484 = shalt.err (!%p481_p4)
}
   0xb   :  { %s510_s21 = smov 128   ;;  %s511_s22 = smov 8  }
   0xc   :  { %23 = dma.hbm_to_vmem [thread:$0]  %s656_s0, 256, %s18_s19, [#allocation3], %s510_s21, %s510_s21, %s511_s22  }
   0xd   :  { %s512_s25 = smov [#allocation4]  }
   0xe   :  { %s29_s26 = sshll.u32 %s512_s25, 4  ;;  %s30_s26 = int_to_ptr.vmem [resolvable:$true] %s29_s26 }
   0xf   :  { %s493_s27 = scalar_lea.vmem %s30_s26, 256  ;;  %p498_p6 = scmp.lt.s32.totalorder %s30_s26, %s30_s26 }
  0x10   :  { %p494_p5 = scmp.ne.s32.totalorder %s30_s26, %s493_s27  ;;  %p499_p7 = scmp.lt.s32.totalorder %s493_s27, %s493_s27 }
  0x12   :  { %p500_p8 = por %p499_p7, %p498_p6 }
  0x14   :  { %p501_p9 = pnand %p500_p8, %p494_p5 }
  0x16   :  { %504 = shalt.err (!%p501_p9)
}
  0x17   :  { %35 = dma.hbm_to_vmem [thread:$0]  %s657_s1, 256, %s30_s26, [#allocation5], %s510_s21, %s510_s21, %s511_s22  }
  0x18   :  { %505 = dma.done.wait [#allocation3], 256  }
  0x19   :  { %506 = vsyncadd [#allocation3], 4294967040 }
  0x1a   :  { %507 = dma.done.wait [#allocation5], 256  }
  0x1b   :  { %508 = vsyncadd [#allocation5], 4294967040  ;;  %vm57_vm0 = vcmask 130048   ;;  %v52_v0 = vld [vmem:[#allocation4 + $0x8] sm:$0xff]  ;;  %v51_v1 = vld [vmem:[#allocation4] sm:$0xff]  ;;  %v53_v32 = vlaneseq  ;;  %vm333_vm1 = vcmask 31744  }
  0x1c   :  { %v49_v2 = vld [vmem:[#allocation2] sm:$0xff]  ;;  %384 = vmatprep.subr.mxu0 %v52_v0  ;;  %v156_v3 = vld [vmem:[%s658_s2 + $0x78] sm:$0xff]  ;;  %v155_v4 = vld [vmem:[%s658_s2 + $0x70] sm:$0xff] }
  0x1d   :  { %388 = vmatprep.mubr.msk.f32.mxu0 %vm57_vm0, %v49_v2  ;;  %385 = vmatpush3.msra.mxu0 %v52_v0  ;;  %v50_v5 = vld [vmem:[#allocation2 + $0x8] sm:$0xff]  ;;  %v153_v7 = vld [vmem:[%s658_s2 + $0x60] sm:$0xff]  ;;  %v152_v8 = vld [vmem:[%s658_s2 + $0x58] sm:$0xff]  ;;  %v54_v33 = vshrl.u32 %v53_v32, 7 }
  0x1e   :  { %391 = vmatprep.subr.mxu1 %v156_v3  ;;  %386 = vmatprep.subr.mxu0 %v51_v1  ;;  %v154_v6 = vld [vmem:[%s658_s2 + $0x68] sm:$0xff]  ;;  %v151_v9 = vld [vmem:[%s658_s2 + $0x50] sm:$0xff]  ;;  %v149_v11 = vld [vmem:[%s658_s2 + $0x40] sm:$0xff] }
  0x1f   :  { %392 = vmatpush3.msra.mxu1 %v156_v3  ;;  %387 = vmatpush3.msra.mxu0 %v51_v1  ;;  %v150_v10 = vld [vmem:[%s658_s2 + $0x48] sm:$0xff]  ;;  %v148_v12 = vld [vmem:[%s658_s2 + $0x38] sm:$0xff]  ;;  %v147_v13 = vld [vmem:[%s658_s2 + $0x30] sm:$0xff]  ;;  %v55_v34 = vsub.s32 0, %v54_v33  ;;  %v159_v47 = vsub.s32 1, %v54_v33  ;;  %v256_v55 = vsub.s32 2, %v54_v33 }
  0x20   :  { %393 = vmatprep.subr.mxu1 %v155_v4  ;;  %389 = vmatmul.mubr.msk.f32.vlgmr.msra.gmra.mxu0 %vm57_vm0, %v50_v5  ;;  %v146_v14 = vld [vmem:[%s658_s2 + $0x28] sm:$0xff]  ;;  %v145_v15 = vld [vmem:[%s658_s2 + $0x20] sm:$0xff]  ;;  %v144_v16 = vld [vmem:[%s658_s2 + $0x18] sm:$0xff] }
  0x21   :  { %394 = vmatpush3.msra.mxu1 %v155_v4  ;;  %v143_v17 = vld [vmem:[%s658_s2 + $0x10] sm:$0xff]  ;;  %v142_v18 = vld [vmem:[%s658_s2 + $0x8] sm:$0xff]  ;;  %v141_v19 = vld [vmem:[%s658_s2] sm:$0xff] }
  0x22   :  { %395 = vmatprep.subr.mxu1 %v154_v6  ;;  %v253_v20 = vld [vmem:[%s659_s3 + $0x78] sm:$0xff]  ;;  %v252_v21 = vld [vmem:[%s659_s3 + $0x70] sm:$0xff]  ;;  %v251_v22 = vld [vmem:[%s659_s3 + $0x68] sm:$0xff] }
  0x23   :  { %396 = vmatpush3.msra.mxu1 %v154_v6  ;;  %426 = vmatprep.subr.mxu0 %v253_v20  ;;  %v250_v23 = vld [vmem:[%s659_s3 + $0x60] sm:$0xff]  ;;  %v249_v24 = vld [vmem:[%s659_s3 + $0x58] sm:$0xff]  ;;  %v248_v25 = vld [vmem:[%s659_s3 + $0x50] sm:$0xff] }
  0x24   :  { %397 = vmatprep.subr.mxu1 %v153_v7  ;;  %427 = vmatpush3.msra.mxu0 %v253_v20  ;;  %v247_v26 = vld [vmem:[%s659_s3 + $0x48] sm:$0xff]  ;;  %v246_v27 = vld [vmem:[%s659_s3 + $0x40] sm:$0xff]  ;;  %v245_v28 = vld [vmem:[%s659_s3 + $0x38] sm:$0xff] }
  0x25   :  { %398 = vmatpush3.msra.mxu1 %v153_v7  ;;  %428 = vmatprep.subr.mxu0 %v252_v21  ;;  %v244_v29 = vld [vmem:[%s659_s3 + $0x30] sm:$0xff]  ;;  %v243_v30 = vld [vmem:[%s659_s3 + $0x28] sm:$0xff]  ;;  %v242_v31 = vld [vmem:[%s659_s3 + $0x20] sm:$0xff] }
  0x26   :  { %399 = vmatprep.subr.mxu1 %v152_v8  ;;  %429 = vmatpush3.msra.mxu0 %v252_v21  ;;  %v48_v35 = vld [vmem:[%s660_s4] sm:$0x7]  ;;  %v241_v43 = vld [vmem:[%s659_s3 + $0x18] sm:$0xff]  ;;  %v240_v44 = vld [vmem:[%s659_s3 + $0x10] sm:$0xff] }
  0x27   :  { %400 = vmatpush3.msra.mxu1 %v152_v8  ;;  %430 = vmatprep.subr.mxu0 %v251_v22  ;;  %v56_v36 = vrot.slane %v48_v35, %v55_v34  ;;  %v239_v45 = vld [vmem:[%s659_s3 + $0x8] sm:$0xff]  ;;  %v238_v46 = vld [vmem:[%s659_s3] sm:$0xff]  ;;  %v160_v48 = vrot.slane %v48_v35, %v159_v47  ;;  %v257_v56 = vrot.slane %v48_v35, %v256_v55 }
  0x28   :  { %401 = vmatprep.subr.mxu1 %v151_v9  ;;  %431 = vmatpush3.msra.mxu0 %v251_v22 }
  0x29   :  { %402 = vmatpush3.msra.mxu1 %v151_v9  ;;  %432 = vmatprep.subr.mxu0 %v250_v23 }
  0x2a   :  { %403 = vmatprep.subr.mxu1 %v150_v10  ;;  %433 = vmatpush3.msra.mxu0 %v250_v23 }
  0x2b   :  { %404 = vmatpush3.msra.mxu1 %v150_v10  ;;  %434 = vmatprep.subr.mxu0 %v249_v24 }
  0x2c   :  { %405 = vmatprep.subr.mxu1 %v149_v11  ;;  %435 = vmatpush3.msra.mxu0 %v249_v24 }
  0x2d   :  { %406 = vmatpush3.msra.mxu1 %v149_v11  ;;  %436 = vmatprep.subr.mxu0 %v248_v25 }
  0x2e   :  { %407 = vmatprep.subr.mxu1 %v148_v12  ;;  %437 = vmatpush3.msra.mxu0 %v248_v25 }
  0x2f   :  { %408 = vmatpush3.msra.mxu1 %v148_v12  ;;  %438 = vmatprep.subr.mxu0 %v247_v26 }
  0x30   :  { %409 = vmatprep.subr.mxu1 %v147_v13  ;;  %439 = vmatpush3.msra.mxu0 %v247_v26 }
  0x31   :  { %410 = vmatpush3.msra.mxu1 %v147_v13  ;;  %440 = vmatprep.subr.mxu0 %v246_v27 }
  0x32   :  { %411 = vmatprep.subr.mxu1 %v146_v14  ;;  %441 = vmatpush3.msra.mxu0 %v246_v27 }
  0x33   :  { %412 = vmatpush3.msra.mxu1 %v146_v14  ;;  %442 = vmatprep.subr.mxu0 %v245_v28 }
  0x34   :  { %413 = vmatprep.subr.mxu1 %v145_v15  ;;  %443 = vmatpush3.msra.mxu0 %v245_v28 }
  0x35   :  { %414 = vmatpush3.msra.mxu1 %v145_v15  ;;  %444 = vmatprep.subr.mxu0 %v244_v29 }
  0x36   :  { %415 = vmatprep.subr.mxu1 %v144_v16  ;;  %445 = vmatpush3.msra.mxu0 %v244_v29 }
  0x37   :  { %416 = vmatpush3.msra.mxu1 %v144_v16  ;;  %446 = vmatprep.subr.mxu0 %v243_v30 }
  0x38   :  { %417 = vmatprep.subr.mxu1 %v143_v17  ;;  %447 = vmatpush3.msra.mxu0 %v243_v30 }
  0x39   :  { %418 = vmatpush3.msra.mxu1 %v143_v17  ;;  %448 = vmatprep.subr.mxu0 %v242_v31 }
  0x3a   :  { %419 = vmatprep.subr.mxu1 %v142_v18  ;;  %449 = vmatpush3.msra.mxu0 %v242_v31 }
  0x3b   :  { %420 = vmatpush3.msra.mxu1 %v142_v18  ;;  %450 = vmatprep.subr.mxu0 %v241_v43 }
  0x3c   :  { %421 = vmatprep.subr.mxu1 %v141_v19  ;;  %451 = vmatpush3.msra.mxu0 %v241_v43 }
  0x3d   :  { %422 = vmatpush3.msra.mxu1 %v141_v19  ;;  %452 = vmatprep.subr.mxu0 %v240_v44 }
  0x3e   :  { %453 = vmatpush3.msra.mxu0 %v240_v44 }
  0x3f   :  { %454 = vmatprep.subr.mxu0 %v239_v45 }
  0x40   :  { %455 = vmatpush3.msra.mxu0 %v239_v45 }
  0x41   :  { %456 = vmatprep.subr.mxu0 %v238_v46 }
  0x42   :  { %457 = vmatpush3.msra.mxu0 %v238_v46 }
  0xe0   :  { %v390_v37 = vpop.f32.mrf.mxu0 }
  0xe1   :  { %v136_v38 = vadd.f32 %v390_v37, %v56_v36 }
  0xe2   :  { %v130_v39 = vpop.f32.mrf.mxu0 }
  0xe3   :  { %v131_v40 = vadd.f32 %v130_v39, %v56_v36  ;;  %v140_v42 = vmax.f32 %v136_v38, 0.0 }
  0xe5   :  { %v139_v41 = vmax.f32 %v131_v40, 0.0 }
  0xe7   :  { %423 = vmatprep.mubr.f32.mxu1 %v139_v41 }
  0xe8   :  { %424 = vmatmul.mubr.f32.vlgmr.msra.gmra.mxu1 %v140_v42 }
 0x1a8   :  { %v425_v49 = vpop.f32.mrf.mxu1 }
 0x1a9   :  { %v233_v50 = vadd.f32 %v425_v49, %v160_v48 }
 0x1aa   :  { %v227_v51 = vpop.f32.mrf.mxu1 }
 0x1ab   :  { %v228_v52 = vadd.f32 %v227_v51, %v160_v48  ;;  %v237_v54 = vmax.f32 %v233_v50, 0.0 }
 0x1ad   :  { %v236_v53 = vmax.f32 %v228_v52, 0.0 }
 0x1af   :  { %458 = vmatprep.mubr.f32.mxu0 %v236_v53 }
 0x1b0   :  { %459 = vmatmul.mubr.f32.vlgmr.msra.gmra.mxu0 %v237_v54 }
 0x270   :  { %v460_v57 = vpop.f32.mrf.mxu0 }
 0x271   :  { %v330_v58 = vadd.f32 %v460_v57, %v257_v56 }
 0x272   :  { %v324_v59 = vpop.f32.mrf.mxu0 }
 0x273   :  { %335 = vst.msk [vmem:[%s661_s5 + $0x8] sm:$0xff] %vm333_vm1, %v330_v58  ;;  %v325_v60 = vadd.f32 %v324_v59, %v257_v56 }
 0x275   :  { %334 = vst.msk [vmem:[%s661_s5] sm:$0xff] %vm333_vm1, %v325_v60 }
 0x276   :  { %340 = vsyncpa [#allocation3], 1 }
 0x277   :  { %341 = vsyncpa [#allocation5], 1 }

</bundles_post_ra>
